<compile_context>
chip_gen: v5e
topology: v5e:2x2
jax: 0.10.0
libtpu: 0.0.40
codegen_flags: <defaults>
</compile_context>

<pallas_src>
import jax
import jax.numpy as jnp
from jax.experimental import pallas as pl
from jax.experimental.pallas import tpu as pltpu


def _make_kernel(a, b):
    """Builds the elementwise kernel with a, b folded in as constants."""
    a = float(a)
    b = float(b)

    def kernel(x_ref, c_ref, cos_ref, sin_ref):
        z = a * x_ref[...] + b * c_ref[...]
        cos_ref[...] = jnp.cos(z)
        sin_ref[...] = jnp.sin(z)

    return kernel


def integration_nn_multi(x, c, a, b, *, tile_rows=1024, lanes=128):
    """Computes (cos(a*x + b*c), sin(a*x + b*c)) with a Pallas TPU kernel.

    x, c: arrays of identical shape (e.g. NCHW (B, C, H, W)).
    a, b: Python scalar parameters of the module (compile-time constants).
    """
    assert x.shape == c.shape and x.dtype == c.dtype
    orig_shape = x.shape
    n = x.size

    # Lane-dense 2D slab: rows x 128. Pick the largest tile that makes sense:
    # requested tile_rows for big inputs, or the (8-rounded) full row count for
    # tiny inputs so we don't over-pad.
    rows = -(-n // lanes)                                   # ceil(n / lanes)
    tr = min(int(tile_rows), max(8, -(-rows // 8) * 8))     # multiple of 8
    rows_pad = -(-rows // tr) * tr                          # whole # of blocks
    n_pad = rows_pad * lanes

    xf = x.reshape(-1)
    cf = c.reshape(-1)
    if n_pad != n:
        xf = jnp.pad(xf, (0, n_pad - n))
        cf = jnp.pad(cf, (0, n_pad - n))
    x2 = xf.reshape(rows_pad, lanes)
    c2 = cf.reshape(rows_pad, lanes)

    grid = (rows_pad // tr,)
    block = pl.BlockSpec((tr, lanes), lambda i: (i, 0))

    cos2, sin2 = pl.pallas_call(
        _make_kernel(a, b),
        out_shape=(
            jax.ShapeDtypeStruct((rows_pad, lanes), x.dtype),
            jax.ShapeDtypeStruct((rows_pad, lanes), x.dtype),
        ),
        grid=grid,
        in_specs=[block, block],
        out_specs=(block, block),
        compiler_params=pltpu.CompilerParams(
            dimension_semantics=("parallel",),
        ),
    )(x2, c2)

    cos_out = cos2.reshape(-1)[:n].reshape(orig_shape)
    sin_out = sin2.reshape(-1)[:n].reshape(orig_shape)
    return cos_out, sin_out


if __name__ == "__main__":
    # Deterministic "parameters" of the module (synthetic init).
    a = 2.0
    b = -0.5

    key = jax.random.PRNGKey(0)
    kx, kc = jax.random.split(key)
    # Small NCHW-shaped inputs, consistent with the elementwise forward.
    x = jax.random.normal(kx, (2, 4, 16, 16), dtype=jnp.float32)
    c = jax.random.normal(kc, (2, 4, 16, 16), dtype=jnp.float32)

    cos_out, sin_out = integration_nn_multi(x, c, a, b)
    jax.block_until_ready(cos_out)
    jax.block_until_ready(sin_out)

    # Reference check against plain JAX.
    z = a * x + b * c
    assert jnp.allclose(cos_out, jnp.cos(z), atol=1e-5, rtol=1e-5)
    assert jnp.allclose(sin_out, jnp.sin(z), atol=1e-5, rtol=1e-5)

    print("KERNEL_OK")
</pallas_src>

<mosaic_0001>
module attributes {stable_mosaic.version = 11 : i64} {
  func.func @kernel(%arg0: i32, %arg1: memref<16x128xf32, #tpu.memory_space<vmem>>, %arg2: memref<16x128xf32, #tpu.memory_space<vmem>>, %arg3: memref<16x128xf32, #tpu.memory_space<vmem>>, %arg4: memref<16x128xf32, #tpu.memory_space<vmem>>) attributes {dimension_semantics = [#tpu.dimension_semantics<parallel>], iteration_bounds = array<i64: 1>, scalar_prefetch = 0 : i64, scratch_operands = 0 : i64, tpu.core_type = #tpu.core_type<tc>, window_params = [{transform_indices = @transform_0, window_bounds = array<i64: 16, 128>}, {transform_indices = @transform_1, window_bounds = array<i64: 16, 128>}, {transform_indices = @transform_2, window_bounds = array<i64: 16, 128>}, {transform_indices = @transform_3, window_bounds = array<i64: 16, 128>}]} {
    %c0 = arith.constant 0 : index
    %c0_0 = arith.constant 0 : index
    %0 = vector.load %arg1[%c0, %c0_0] : memref<16x128xf32, #tpu.memory_space<vmem>>, vector<16x128xf32>
    %cst = arith.constant 2.000000e+00 : f32
    %1 = vector.broadcast %cst : f32 to vector<16x128xf32>
    %2 = arith.mulf %1, %0 : vector<16x128xf32>
    %c0_1 = arith.constant 0 : index
    %c0_2 = arith.constant 0 : index
    %3 = vector.load %arg2[%c0_1, %c0_2] : memref<16x128xf32, #tpu.memory_space<vmem>>, vector<16x128xf32>
    %cst_3 = arith.constant -5.000000e-01 : f32
    %4 = vector.broadcast %cst_3 : f32 to vector<16x128xf32>
    %5 = arith.mulf %4, %3 : vector<16x128xf32>
    %6 = arith.addf %2, %5 : vector<16x128xf32>
    %7 = math.cos %6 : vector<16x128xf32>
    %c0_4 = arith.constant 0 : index
    %c0_5 = arith.constant 0 : index
    %8 = vector.load %arg3[%c0_4, %c0_5] : memref<16x128xf32, #tpu.memory_space<vmem>>, vector<16x128xf32>
    tpu.vector_store %arg3[%c0_4, %c0_5], %7 {strides = array<i32>} : memref<16x128xf32, #tpu.memory_space<vmem>>, vector<16x128xf32>,
    %9 = math.sin %6 : vector<16x128xf32>
    %c0_6 = arith.constant 0 : index
    %c0_7 = arith.constant 0 : index
    %10 = vector.load %arg4[%c0_6, %c0_7] : memref<16x128xf32, #tpu.memory_space<vmem>>, vector<16x128xf32>
    tpu.vector_store %arg4[%c0_6, %c0_7], %9 {strides = array<i32>} : memref<16x128xf32, #tpu.memory_space<vmem>>, vector<16x128xf32>,
    return
  }
  func.func @transform_0(%arg0: i32) -> (i32, i32) {
    %c0_i32 = arith.constant 0 : i32
    %c0_i32_0 = arith.constant 0 : i32
    return %arg0, %c0_i32 : i32, i32
  }
  func.func @transform_1(%arg0: i32) -> (i32, i32) {
    %c0_i32 = arith.constant 0 : i32
    %c0_i32_0 = arith.constant 0 : i32
    return %arg0, %c0_i32 : i32, i32
  }
  func.func @transform_2(%arg0: i32) -> (i32, i32) {
    %c0_i32 = arith.constant 0 : i32
    %c0_i32_0 = arith.constant 0 : i32
    return %arg0, %c0_i32 : i32, i32
  }
  func.func @transform_3(%arg0: i32) -> (i32, i32) {
    %c0_i32 = arith.constant 0 : i32
    %c0_i32_0 = arith.constant 0 : i32
    return %arg0, %c0_i32 : i32, i32
  }
}

</mosaic_0001>

<bundles_post_ra>
// kernel: tpu_custom_call.1
= control target key start
LH: loop header
LB: loop body
LE: loop exit
PB: predicated region body
PF: predicated region fallthrough
CT: control target
= control target key end

     0   :  { %9 = vsyncpa [#allocation3], 0  ;;  %s1073_s0 = inlined_call_operand.hbm [shape: f32[16,128], index: 0, kind: input, shape index: {}]   ;;  %s1074_s1 = inlined_call_operand.hbm [shape: f32[16,128], index: 1, kind: input, shape index: {}]   ;;  %s1075_s2 = inlined_call_operand.hbm [shape: f32[16,128], index: 2, kind: output, shape index: {0}]   ;;  %s1076_s3 = inlined_call_operand.hbm [shape: f32[16,128], index: 3, kind: output, shape index: {1}]  }
   0x1   :  { %10 = vsyncpa [#allocation6], 0 }
   0x2   :  { %11 = vsyncpa [#allocation4], 0 }
   0x3   :  { %12 = vsyncpa [#allocation9], 0  ;;  %s17_s14 = sshll.u32 %s1073_s0, 4  ;;  %s846_s15 = smov [#allocation2]   ;;  %s18_s14 = int_to_ptr.hbm [resolvable:$true] %s17_s14 }
   0x4   :  { %s19_s16 = sshll.u32 %s846_s15, 4  ;;  %s30_s19 = sshll.u32 %s1074_s1, 4  ;;  %s20_s16 = int_to_ptr.vmem [resolvable:$true] %s19_s16  ;;  %s31_s19 = int_to_ptr.hbm [resolvable:$true] %s30_s19 }
   0x5   :  { %s847_s20 = smov 128   ;;  %s848_s21 = smov 8  }
   0x6   :  { %25 = dma.hbm_to_vmem [thread:$0]  %s18_s14, 256, %s20_s16, [#allocation3], %s847_s20, %s847_s20, %s848_s21  }
   0x7   :  { %s849_s22 = smov [#allocation5]  }
   0x8   :  { %s32_s23 = sshll.u32 %s849_s22, 4  ;;  %s33_s23 = int_to_ptr.vmem [resolvable:$true] %s32_s23 }
   0x9   :  { %38 = dma.hbm_to_vmem [thread:$0]  %s31_s19, 256, %s33_s23, [#allocation6], %s847_s20, %s847_s20, %s848_s21  }
   0xa   :  { %838 = dma.done.wait [#allocation3], 256  }
   0xb   :  { %839 = vsyncadd [#allocation3], 4294967040 }
   0xc   :  { %840 = dma.done.wait [#allocation6], 256  }
   0xd   :  { %841 = vsyncadd [#allocation6], 4294967040  ;;  %v47_v0 = vld [vmem:[#allocation2] sm:$0xff]  ;;  %v51_v1 = vld [vmem:[#allocation5] sm:$0xff]  ;;  %v850_v31 = vmov 683565275  }
   0xe   :  { %v48_v2 = vld [vmem:[#allocation2 + $0x8] sm:$0xff]  ;;  %v49_v3 = vmul.f32 2.0, %v47_v0  ;;  %v53_v4 = vmul.f32 -0.5, %v51_v1  ;;  %v52_v6 = vld [vmem:[#allocation5 + $0x8] sm:$0xff]  ;;  %v851_v33 = vmov 2475754826  }
   0xf   :  { %v50_v5 = vmul.f32 2.0, %v48_v2  ;;  %v54_v7 = vmul.f32 -0.5, %v52_v6  ;;  %v852_v35 = vmov 2131351028   ;;  %v853_v37 = vmov 2102212464  }
  0x10   :  { %v891_v8 = vadd.f32 %v53_v4, %v49_v3  ;;  %v854_v39 = vmov 920167782   ;;  %v855_v48 = vmov 1326507024   ;;  %s857_s0 = smov [#allocation7]   ;;  %s685_s26 = sshll.u32 %s1075_s2, 4  ;;  %s686_s26 = int_to_ptr.hbm [resolvable:$true] %s685_s26 }
  0x11   :  { %v893_v9 = vadd.f32 %v54_v7, %v50_v5  ;;  %s683_s1 = sshll.u32 %s857_s0, 4  ;;  %s858_s27 = smov [#allocation8]   ;;  %s684_s1 = int_to_ptr.vmem [resolvable:$true] %s683_s1 }
  0x12   :  { %v57_v10 = vand.u32 2147483647, %v891_v8  ;;  %v60_v11 = vand.u32 2139095040, %v891_v8  ;;  %s696_s28 = sshll.u32 %s858_s27, 4  ;;  %s698_s4 = sshll.u32 %s1076_s3, 4  ;;  %s697_s28 = int_to_ptr.vmem [resolvable:$true] %s696_s28  ;;  %s699_s4 = int_to_ptr.hbm [resolvable:$true] %s698_s4 }
  0x13   :  { %v211_v12 = vand.u32 2147483647, %v893_v9  ;;  %v214_v13 = vand.u32 2139095040, %v893_v9 }
  0x14   :  { %v61_v14 = vshrl.u32 %v60_v11, 23  ;;  %v64_v15 = vand.u32 8388607, %v57_v10 }
  0x15   :  { %v215_v16 = vshrl.u32 %v214_v13, 23  ;;  %v218_v20 = vand.u32 8388607, %v211_v12 }
  0x16   :  { %v717_v17 = vadd.s32 4294967169, %v61_v14  ;;  %v65_v18 = vor.u32 8388608, %v64_v15 }
  0x17   :  { %v720_v19 = vadd.s32 4294967169, %v215_v16  ;;  %v219_v25 = vor.u32 8388608, %v218_v20 }
  0x18   :  { %v67_v21 = vadd.s32 1, %v717_v17  ;;  %v903_v24 = vshll.u32 %v65_v18, 8 }
  0x19   :  { %v221_v22 = vadd.s32 1, %v720_v19  ;;  %v913_v42 = vshll.u32 %v219_v25, 8 }
  0x1a   :  { %vm68_vm0 = vcmp.gt.s32.totalorder %v67_v21, 0  ;;  %v106_v41 = vand.u32 65535, %v903_v24  ;;  %v107_v46 = vshrl.u32 %v903_v24, 16 }
  0x1b   :  { %v69_v23 = vsel %vm68_vm0, %v67_v21, 0  ;;  %vm222_vm1 = vcmp.gt.s32.totalorder %v221_v22, 0 }
  0x1c   :  { %v71_v26 = vand.u32 31, %v69_v23  ;;  %v223_v27 = vsel %vm222_vm1, %v221_v22, 0  ;;  %v905_v28 = vshrl.u32 %v69_v23, 5 }
  0x1d   :  { %v907_v29 = vand.u32 31, %v223_v27  ;;  %v931_v59 = vshrl.u32 %v223_v27, 5 }
  0x1e   :  { %v72_v30 = vsub.s32 32, %v71_v26  ;;  %v74_v32 = vshll.u32 %v850_v31, %v71_v26  ;;  %v77_v34 = vshll.u32 %v851_v33, %v71_v26  ;;  %v80_v36 = vshll.u32 %v852_v35, %v71_v26 }
  0x1f   :  { %v83_v38 = vshll.u32 %v853_v37, %v71_v26  ;;  %v86_v40 = vshll.u32 %v854_v39, %v71_v26  ;;  %vm89_vm2 = vcmp.lt.s32.totalorder %v905_v28, 1  ;;  %vm92_vm3 = vcmp.lt.s32.totalorder %v905_v28, 4 }
  0x20   :  { %v75_v43 = vshrl.u32 %v851_v33, %v72_v30  ;;  %v78_v44 = vshrl.u32 %v852_v35, %v72_v30  ;;  %v81_v45 = vshrl.u32 %v853_v37, %v72_v30  ;;  %v84_v47 = vshrl.u32 %v854_v39, %v72_v30 }
  0x21   :  { %v87_v49 = vshrl.u32 %v855_v48, %v72_v30  ;;  %v922_v53 = vsub.s32 32, %v907_v29  ;;  %v73_v54 = vshrl.u32 %v850_v31, %v72_v30  ;;  %vm91_vm4 = vcmp.lt.s32.totalorder %v905_v28, 3 }
  0x22   :  { %v76_v50 = vor.u32 %v75_v43, %v74_v32  ;;  %v79_v51 = vor.u32 %v78_v44, %v77_v34  ;;  %v82_v52 = vor.u32 %v81_v45, %v80_v36  ;;  %v85_v55 = vor.u32 %v84_v47, %v83_v38 }
  0x23   :  { %v88_v56 = vor.u32 %v87_v49, %v86_v40  ;;  %vm90_vm5 = vcmp.lt.s32.totalorder %v905_v28, 2  ;;  %v228_v62 = vshll.u32 %v850_v31, %v907_v29  ;;  %v231_v63 = vshll.u32 %v851_v33, %v907_v29 }
  0x24   :  { %v97_v57 = vsel %vm89_vm2, %v76_v50, %v79_v51  ;;  %v101_v58 = vsel %vm89_vm2, %v79_v51, %v82_v52  ;;  %v98_v60 = vsel %vm92_vm3, %v85_v55, 920167782  ;;  %v94_v0 = vsel %vm92_vm3, %v82_v52, 2102212464 }
  0x25   :  { %v102_v61 = vsel %vm92_vm3, %v88_v56, 1326507024  ;;  %v99_v1 = vsel %vm91_vm4, %v82_v52, %v98_v60  ;;  %v229_v3 = vshrl.u32 %v851_v33, %v922_v53  ;;  %v93_v4 = vsel %vm89_vm2, %v73_v54, %v76_v50 }
  0x26   :  { %v103_v2 = vsel %vm91_vm4, %v85_v55, %v102_v61  ;;  %v100_v5 = vsel %vm90_vm5, %v97_v57, %v99_v1  ;;  %v232_v7 = vshrl.u32 %v852_v35, %v922_v53  ;;  %v95_v16 = vsel %vm91_vm4, %v79_v51, %v94_v0 }
  0x27   :  { %v104_v6 = vsel %vm90_vm5, %v101_v58, %v103_v2  ;;  %v130_v14 = vand.u32 65535, %v100_v5  ;;  %v131_v15 = vshrl.u32 %v100_v5, 16  ;;  %v956_v17 = vor.u32 %v229_v3, %v228_v62 }
  0x28   :  { %v108_v11 = vand.u32 65535, %v104_v6  ;;  %v109_v13 = vshrl.u32 %v104_v6, 16  ;;  %v958_v18 = vor.u32 %v232_v7, %v231_v63  ;;  %v234_v19 = vshll.u32 %v852_v35, %v907_v29 }
  0x29   :  { %v235_v23 = vshrl.u32 %v853_v37, %v922_v53  ;;  %v132_v26 = vmul.u32 %v130_v14, %v106_v41  ;;  %v133_v27 = vmul.u32 %v131_v15, %v106_v41  ;;  %v134_v30 = vmul.u32 %v130_v14, %v107_v46 }
  0x2a   :  { %v110_v20 = vmul.u32 %v108_v11, %v106_v41  ;;  %v111_v21 = vmul.u32 %v109_v13, %v106_v41  ;;  %v112_v22 = vmul.u32 %v108_v11, %v107_v46  ;;  %v113_v25 = vmul.u32 %v109_v13, %v107_v46 }
  0x2b   :  { %v135_v36 = vmul.u32 %v131_v15, %v107_v46  ;;  %v136_v40 = vshll.u32 %v133_v27, 16  ;;  %v137_v43 = vshrl.u32 %v133_v27, 16  ;;  %v138_v44 = vshll.u32 %v134_v30, 16 }
  0x2c   :  { %v114_v32 = vshll.u32 %v111_v21, 16  ;;  %v115_v33 = vshrl.u32 %v111_v21, 16  ;;  %v116_v34 = vshll.u32 %v112_v22, 16  ;;  %v117_v38 = vshrl.u32 %v112_v22, 16 }
  0x2d   :  { %v139_v45 = vshrl.u32 %v134_v30, 16  ;;  %v237_v47 = vshll.u32 %v853_v37, %v907_v29  ;;  %v856_v49 = vmov 0   ;;  %vm140_vm7 = vc.u32 %v132_v26, %v136_v40 }
  0x2e   :  { %vm118_vm6 = vc.u32 %v110_v20, %v114_v32  ;;  %v120_v35 = vadd.s32 %v114_v32, %v110_v20  ;;  %v142_v41 = vadd.s32 %v136_v40, %v132_v26  ;;  %v238_v51 = vshrl.u32 %v854_v39, %v922_v53 }
  0x2f   :  { %v119_v50 = vsel %vm118_vm6, 1, %v856_v49  ;;  %v141_v46 = vsel %vm140_vm7, 1, %v856_v49  ;;  %v240_v54 = vshll.u32 %v854_v39, %v907_v29  ;;  %v236_v37 = vor.u32 %v235_v23, %v234_v19 }
  0x30   :  { %v121_v52 = vadd.s32 %v119_v50, %v113_v25  ;;  %vm122_vm8 = vc.u32 %v120_v35, %v116_v34  ;;  %v143_v56 = vadd.s32 %v141_v46, %v135_v36  ;;  %vm144_vm9 = vc.u32 %v142_v41, %v138_v44 }
  0x31   :  { %v123_v55 = vsel %vm122_vm8, 1, %v856_v49  ;;  %v145_v58 = vsel %vm144_vm9, 1, %v856_v49  ;;  %v239_v60 = vor.u32 %v238_v51, %v237_v47  ;;  %v241_v61 = vshrl.u32 %v855_v48, %v922_v53 }
  0x32   :  { %v125_v57 = vadd.s32 %v123_v55, %v121_v52  ;;  %v975_v62 = vadd.s32 %v142_v41, %v138_v44  ;;  %v147_v63 = vadd.s32 %v145_v58, %v143_v56  ;;  %vm243_vm10 = vcmp.lt.s32.totalorder %v931_v59, 1 }
  0x33   :  { %vm245_vm11 = vcmp.lt.s32.totalorder %v931_v59, 3  ;;  %v242_v39 = vor.u32 %v241_v61, %v240_v54  ;;  %vm244_vm12 = vcmp.lt.s32.totalorder %v931_v59, 2  ;;  %vm246_vm13 = vcmp.lt.s32.totalorder %v931_v59, 4 }
  0x34   :  { %v126_v29 = vadd.s32 %v125_v57, %v115_v33  ;;  %v96_v0 = vsel %vm90_vm5, %v93_v4, %v95_v16  ;;  %v148_v1 = vadd.s32 %v147_v63, %v137_v43  ;;  %v251_v48 = vsel %vm243_vm10, %v956_v17, %v958_v18 }
  0x35   :  { %v252_v2 = vsel %vm246_vm13, %v239_v60, 920167782  ;;  %v255_v6 = vsel %vm243_vm10, %v958_v18, %v236_v37  ;;  %v260_v28 = vand.u32 65535, %v913_v42  ;;  %v256_v11 = vsel %vm246_vm13, %v242_v39, 1326507024 }
  0x36   :  { %v989_v3 = vadd.s32 %v126_v29, %v117_v38  ;;  %v253_v5 = vsel %vm245_vm11, %v236_v37, %v252_v2  ;;  %v149_v4 = vadd.s32 %v148_v1, %v139_v45  ;;  %v261_v13 = vshrl.u32 %v913_v42, 16 }
  0x37   :  { %v254_v7 = vsel %vm244_vm12, %v251_v48, %v253_v5  ;;  %v150_v14 = vmul.u32 %v903_v24, %v96_v0  ;;  %v257_v15 = vsel %vm245_vm11, %v239_v60, %v256_v11  ;;  %v227_v26 = vshrl.u32 %v850_v31, %v922_v53 }
  0x38   :  { %vm152_vm14 = vc.u32 %v989_v3, %v975_v62  ;;  %v284_v16 = vand.u32 65535, %v254_v7  ;;  %v153_v19 = vadd.s32 1, %v149_v4  ;;  %v258_v20 = vsel %vm244_vm12, %v255_v6, %v257_v15 }
  0x39   :  { %v285_v21 = vshrl.u32 %v254_v7, 16  ;;  %v262_v22 = vand.u32 65535, %v258_v20  ;;  %v263_v23 = vshrl.u32 %v258_v20, 16  ;;  %v248_v43 = vsel %vm246_vm13, %v236_v37, 2102212464 }
  0x3a   :  { %v154_v25 = vsel %vm152_vm14, %v153_v19, %v149_v4  ;;  %v288_v24 = vmul.u32 %v284_v16, %v261_v13  ;;  %v286_v34 = vmul.u32 %v284_v16, %v260_v28  ;;  %v247_v45 = vsel %vm243_vm10, %v227_v26, %v956_v17 }
  0x3b   :  { %v287_v27 = vmul.u32 %v285_v21, %v260_v28  ;;  %v155_v30 = vadd.s32 %v154_v25, %v150_v14  ;;  %v264_v32 = vmul.u32 %v262_v22, %v260_v28  ;;  %v265_v33 = vmul.u32 %v263_v23, %v260_v28 }
  0x3c   :  { %v266_v36 = vmul.u32 %v262_v22, %v261_v13  ;;  %v267_v44 = vmul.u32 %v263_v23, %v261_v13  ;;  %v289_v31 = vmul.u32 %v285_v21, %v261_v13  ;;  %v292_v53 = vshll.u32 %v288_v24, 16 }
  0x3d   :  { %v290_v38 = vshll.u32 %v287_v27, 16  ;;  %v156_v40 = vadd.s32 536870912, %v155_v30  ;;  %v268_v35 = vshll.u32 %v265_v33, 16  ;;  %v249_v51 = vsel %vm245_vm11, %v958_v18, %v248_v43 }
  0x3e   :  { %v270_v47 = vshll.u32 %v266_v36, 16  ;;  %v269_v17 = vshrl.u32 %v265_v33, 16  ;;  %v291_v57 = vshrl.u32 %v287_v27, 16  ;;  %v271_v61 = vshrl.u32 %v266_v36, 16 }
  0x3f   :  { %v1016_v50 = vshrl.u32 %v156_v40, 30  ;;  %vm272_vm15 = vc.u32 %v264_v32, %v268_v35  ;;  %v274_v41 = vadd.s32 %v268_v35, %v264_v32  ;;  %vm294_vm0 = vc.u32 %v286_v34, %v290_v38 }
  0x40   :  { %v273_v52 = vsel %vm272_vm15, 1, %v856_v49  ;;  %v295_v46 = vsel %vm294_vm0, 1, %v856_v49  ;;  %v296_v54 = vadd.s32 %v290_v38, %v286_v34  ;;  %v293_v29 = vshrl.u32 %v288_v24, 16 }
  0x41   :  { %v158_v55 = vshll.u32 %v1016_v50, 30  ;;  %v275_v56 = vadd.s32 %v273_v52, %v267_v44  ;;  %vm276_vm1 = vc.u32 %v274_v41, %v270_v47  ;;  %v297_v58 = vadd.s32 %v295_v46, %v289_v31 }
  0x42   :  { %v277_v37 = vsel %vm276_vm1, 1, %v856_v49  ;;  %vm298_vm2 = vc.u32 %v296_v54, %v292_v53  ;;  %v300_v48 = vadd.s32 %v296_v54, %v292_v53  ;;  %v250_v2 = vsel %vm244_vm12, %v247_v45, %v249_v51 }
  0x43   :  { %v159_v60 = vsub.s32 %v155_v30, %v158_v55  ;;  %v279_v63 = vadd.s32 %v277_v37, %v275_v56  ;;  %v299_v18 = vsel %vm298_vm2, 1, %v856_v49  ;;  %v304_v11 = vmul.u32 %v913_v42, %v250_v2 }
  0x44   :  { %v301_v39 = vadd.s32 %v299_v18, %v297_v58  ;;  %v151_v49 = vadd.s32 %v975_v62, %v989_v3  ;;  %v181_v36 = vsub.s32 4, %v1016_v50  ;;  %vm59_vm7 = vcmp.lt.s32.totalorder %v891_v8, 0 }
  0x45   :  { %vm160_vm3 = vcmp.lt.s32.totalorder %v159_v60, 0  ;;  %v161_v0 = vsub.s32 0, %v159_v60  ;;  %v280_v1 = vadd.s32 %v279_v63, %v269_v17  ;;  %vm58_vm8 = vcmp.le.f32.partialorder %v57_v10, 0.7853982 }
  0x46   :  { %v302_v5 = vadd.s32 %v301_v39, %v291_v57  ;;  %v182_v35 = vsel %vm59_vm7, %v181_v36, %v1016_v50  ;;  %vm213_vm11 = vcmp.lt.s32.totalorder %v893_v9, 0  ;;  %vm1043_vm13 = vcmp.le.f32.partialorder %v211_v12, 0.7853982 }
  0x47   :  { %v162_v6 = vsel %vm160_vm3, %v161_v0, %v159_v60  ;;  %v281_v28 = vadd.s32 %v280_v1, %v271_v61  ;;  %v184_v41 = vsel %vm58_vm8, 0, %v182_v35  ;;  %vm200_vm2 = vweird.f32 %v891_v8 }
  0x48   :  { %v163_v4 = vclz %v162_v6  ;;  %v303_v7 = vadd.s32 %v302_v5, %v293_v29  ;;  %v511_v58 = vadd.s32 3, %v184_v41  ;;  %v201_v39 = vand.u32 3, %v184_v41 }
  0x49   :  { %vm306_vm4 = vc.u32 %v281_v28, %v300_v48  ;;  %v305_v53 = vadd.s32 %v300_v48, %v281_v28 }
  0x4a   :  { %v718_v13 = vadd.s32 4294967294, %v163_v4  ;;  %v307_v14 = vadd.s32 1, %v303_v7  ;;  %v512_v48 = vand.u32 3, %v511_v58  ;;  %vm206_vm10 = vcmp.eq.s32.totalorder %v201_v39, 2 }
  0x4b   :  { %vm202_vm14 = vcmp.lt.s32.totalorder %v201_v39, 2  ;;  %vm203_vm15 = vcmp.eq.s32.totalorder %v201_v39, 0 }
  0x4c   :  { %vm719_vm5 = vcmp.lt.s32.totalorder %v718_v13, 0  ;;  %v308_v15 = vsel %vm306_vm4, %v307_v14, %v303_v7  ;;  %vm517_vm12 = vcmp.eq.s32.totalorder %v512_v48, 2  ;;  %vm514_vm0 = vcmp.eq.s32.totalorder %v512_v48, 0 }
  0x4d   :  { %v166_v16 = vsel %vm719_vm5, 0, %v718_v13  ;;  %v309_v19 = vadd.s32 %v308_v15, %v304_v11  ;;  %vm513_vm1 = vcmp.lt.s32.totalorder %v512_v48, 2 }
  0x4e   :  { %v167_v20 = vsub.s32 32, %v166_v16  ;;  %v168_v59 = vshll.u32 %v159_v60, %v166_v16  ;;  %v171_v21 = vsub.s32 4294967266, %v166_v16 }
  0x4f   :  { %v310_v22 = vadd.s32 536870912, %v309_v19 }
  0x50   :  { %v169_v23 = vshrl.u32 %v151_v49, %v167_v20  ;;  %v172_v25 = vadd.s32 127, %v171_v21 }
  0x51   :  { %v1031_v26 = vshrl.u32 %v310_v22, 30 }
  0x52   :  { %v170_v27 = vor.u32 %v169_v23, %v168_v59  ;;  %v173_v42 = vshll.u32 %v172_v25, 23 }
  0x53   :  { %v312_v24 = vshll.u32 %v1031_v26, 30  ;;  %v335_v49 = vsub.s32 4, %v1031_v26 }
  0x54   :  { %v174_v30 = vor.u32 4788187, %v173_v42  ;;  %v177_v32 = vcvt.s32.f32 %v170_v27 }
  0x55   :  { %v313_v33 = vsub.s32 %v309_v19, %v312_v24  ;;  %v336_v12 = vsel %vm213_vm11, %v335_v49, %v1031_v26 }
  0x56   :  { %v175_v62 = vand.u32 2147483647, %v174_v30 }
  0x57   :  { %vm314_vm6 = vcmp.lt.s32.totalorder %v313_v33, 0  ;;  %v315_v3 = vsub.s32 0, %v313_v33 }
  0x58   :  { %v178_v34 = vmul.f32 %v177_v32, %v175_v62 }
  0x59   :  { %v316_v38 = vsel %vm314_vm6, %v315_v3, %v313_v33 }
  0x5a   :  { %v179_v40 = vxor.u32 2147483648, %v178_v34  ;;  %v317_v43 = vclz %v316_v38 }
  0x5c   :  { %v180_v44 = vsel %vm59_vm7, %v179_v40, %v178_v34  ;;  %v721_v45 = vadd.s32 4294967294, %v317_v43 }
  0x5d   :  { %v183_v47 = vsel %vm58_vm8, %v891_v8, %v180_v44  ;;  %v338_v8 = vsel %vm1043_vm13, 0, %v336_v12 }
  0x5e   :  { %v185_v31 = vmul.f32 %v183_v47, %v183_v47  ;;  %vm722_vm9 = vcmp.lt.s32.totalorder %v721_v45, 0  ;;  %v666_v26 = vadd.s32 3, %v338_v8  ;;  %v355_v43 = vand.u32 3, %v338_v8 }
  0x5f   :  { %v320_v51 = vsel %vm722_vm9, 0, %v721_v45  ;;  %vm354_vm9 = vweird.f32 %v893_v9 }
  0x60   :  { %v186_v52 = vmul.f32 -0.001358992, %v185_v31  ;;  %v193_v46 = vmul.f32 -0.00019511016, %v185_v31  ;;  %v321_v54 = vsub.s32 32, %v320_v51  ;;  %v322_v55 = vshll.u32 %v313_v33, %v320_v51 }
  0x61   :  { %v325_v17 = vsub.s32 4294967266, %v320_v51  ;;  %v667_v44 = vand.u32 3, %v666_v26  ;;  %vm360_vm3 = vcmp.eq.s32.totalorder %v355_v43, 2  ;;  %vm356_vm5 = vcmp.lt.s32.totalorder %v355_v43, 2 }
  0x62   :  { %v187_v56 = vadd.f32 0.041655596, %v186_v52  ;;  %v194_v10 = vadd.f32 0.008332121, %v193_v46  ;;  %v323_v37 = vshrl.u32 %v305_v53, %v321_v54  ;;  %vm357_vm6 = vcmp.eq.s32.totalorder %v355_v43, 0 }
  0x63   :  { %v326_v57 = vadd.s32 127, %v325_v17  ;;  %vm672_vm4 = vcmp.eq.s32.totalorder %v667_v44, 2  ;;  %vm669_vm7 = vcmp.eq.s32.totalorder %v667_v44, 0  ;;  %vm668_vm8 = vcmp.lt.s32.totalorder %v667_v44, 2 }
  0x64   :  { %v188_v60 = vmul.f32 %v187_v56, %v185_v31  ;;  %v195_v50 = vmul.f32 %v194_v10, %v185_v31  ;;  %v324_v61 = vor.u32 %v323_v37, %v322_v55 }
  0x65   :  { %v327_v63 = vshll.u32 %v326_v57, 23 }
  0x66   :  { %v189_v18 = vadd.f32 -0.4999988, %v188_v60  ;;  %v196_v29 = vadd.f32 -0.16666654, %v195_v50  ;;  %v331_v1 = vcvt.s32.f32 %v324_v61 }
  0x67   :  { %v328_v0 = vor.u32 4788187, %v327_v63 }
  0x68   :  { %v190_v2 = vmul.f32 %v189_v18, %v185_v31  ;;  %v197_v5 = vmul.f32 %v196_v29, %v185_v31 }
  0x69   :  { %v329_v6 = vand.u32 2147483647, %v328_v0 }
  0x6a   :  { %v191_v28 = vadd.f32 1.0, %v190_v2  ;;  %v198_v4 = vadd.f32 1.0, %v197_v5 }
  0x6b   :  { %v332_v7 = vmul.f32 %v331_v1, %v329_v6 }
  0x6c   :  { %v199_v11 = vmul.f32 %v198_v4, %v183_v47  ;;  %v207_v13 = vxor.u32 2147483648, %v191_v28 }
  0x6d   :  { %v333_v15 = vxor.u32 2147483648, %v332_v7 }
  0x6e   :  { %v204_v16 = vxor.u32 2147483648, %v199_v11  ;;  %v208_v19 = vsel %vm206_vm10, %v207_v13, %v199_v11  ;;  %v519_v20 = vsel %vm517_vm12, %v207_v13, %v199_v11 }
  0x6f   :  { %v334_v59 = vsel %vm213_vm11, %v333_v15, %v332_v7 }
  0x70   :  { %v205_v21 = vsel %vm203_vm15, %v191_v28, %v204_v16  ;;  %v337_v22 = vsel %vm1043_vm13, %v893_v9, %v334_v59  ;;  %v516_v23 = vsel %vm514_vm0, %v191_v28, %v204_v16 }
  0x71   :  { %v209_v25 = vsel %vm202_vm14, %v205_v21, %v208_v19  ;;  %v339_v27 = vmul.f32 %v337_v22, %v337_v22  ;;  %v520_v42 = vsel %vm513_vm1, %v516_v23, %v519_v20 }
  0x72   :  { %v210_v24 = vsel %vm200_vm2, nan, %v209_v25  ;;  %v521_v30 = vsel %vm200_vm2, nan, %v520_v42 }
  0x73   :  { %365 = vst [vmem:[#allocation7] sm:$0xff] %v210_v24  ;;  %v340_v32 = vmul.f32 -0.001358992, %v339_v27  ;;  %v347_v33 = vmul.f32 -0.00019511016, %v339_v27 }
  0x74   :  { %677 = vst [vmem:[#allocation8] sm:$0xff] %v521_v30 }
  0x75   :  { %v341_v62 = vadd.f32 0.041655596, %v340_v32  ;;  %v348_v3 = vadd.f32 0.008332121, %v347_v33 }
  0x77   :  { %v342_v34 = vmul.f32 %v341_v62, %v339_v27  ;;  %v349_v36 = vmul.f32 %v348_v3, %v339_v27 }
  0x79   :  { %v343_v38 = vadd.f32 -0.4999988, %v342_v34  ;;  %v350_v40 = vadd.f32 -0.16666654, %v349_v36 }
  0x7b   :  { %v344_v35 = vmul.f32 %v343_v38, %v339_v27  ;;  %v351_v45 = vmul.f32 %v350_v40, %v339_v27 }
  0x7d   :  { %v345_v47 = vadd.f32 1.0, %v344_v35  ;;  %v352_v31 = vadd.f32 1.0, %v351_v45 }
  0x7f   :  { %v353_v53 = vmul.f32 %v352_v31, %v337_v22  ;;  %v361_v41 = vxor.u32 2147483648, %v345_v47 }
  0x81   :  { %v358_v51 = vxor.u32 2147483648, %v353_v53  ;;  %v362_v52 = vsel %vm360_vm3, %v361_v41, %v353_v53  ;;  %v674_v46 = vsel %vm672_vm4, %v361_v41, %v353_v53 }
  0x83   :  { %v359_v54 = vsel %vm357_vm6, %v345_v47, %v358_v51  ;;  %v671_v55 = vsel %vm669_vm7, %v345_v47, %v358_v51 }
  0x84   :  { %v363_v17 = vsel %vm356_vm5, %v359_v54, %v362_v52  ;;  %v675_v56 = vsel %vm668_vm8, %v671_v55, %v674_v46 }
  0x85   :  { %v364_v10 = vsel %vm354_vm9, nan, %v363_v17  ;;  %v676_v37 = vsel %vm354_vm9, nan, %v675_v56 }
  0x86   :  { %366 = vst [vmem:[#allocation7 + $0x8] sm:$0xff] %v364_v10 }
  0x87   :  { %678 = vst [vmem:[#allocation8 + $0x8] sm:$0xff] %v676_v37  ;;  %691 = dma.vmem_to_hbm [thread:$0]  %s684_s1, 256, %s686_s26, [#allocation4], %s847_s20, %s847_s20, %s848_s21  }
  0x88   :  { %704 = dma.vmem_to_hbm [thread:$0]  %s697_s28, 256, %s699_s4, [#allocation9], %s847_s20, %s847_s20, %s848_s21  }
  0x89   :  { %842 = dma.done.wait [#allocation4], 256  }
  0x8a   :  { %843 = vsyncadd [#allocation4], 4294967040 }
  0x8b   :  { %844 = dma.done.wait [#allocation9], 256  }
  0x8c   :  { %845 = vsyncadd [#allocation9], 4294967040 }
  0x8d   :  { %713 = vsyncpa [#allocation3], 1 }
  0x8e   :  { %714 = vsyncpa [#allocation6], 1 }
  0x8f   :  { %715 = vsyncpa [#allocation4], 1 }
  0x90   :  { %716 = vsyncpa [#allocation9], 1 }

</bundles_post_ra>
